<compile_context>
chip_gen: v5e
topology: v5e:2x2
jax: 0.10.0
libtpu: 0.0.40
codegen_flags: <defaults>
</compile_context>

<pallas_src>
import jax
import jax.numpy as jnp
from jax import lax
from jax.experimental import pallas as pl
from jax.experimental.pallas import tpu as pltpu

# ----------------------------- configuration ---------------------------------
B = 2          # batch
T = 8          # seq_len (motion tokens)
D = 32         # latent_dim
L = 24         # text_latent_dim
N = 6          # text tokens
H = 4          # num_head
DH = D // H    # head dim
E = 64         # time_embed_dim
EPS = 1e-5

# ------------------------- packed parameter slab ------------------------------
# One lane-dense (128-wide) bf16 slab -> a single parameter DMA.
#
# Band 0 (rows [0, 32)):
#   cols [  0: 32)  wq        (D, D)    -- LayerNorm(x) affine folded in
#   cols [ 32: 64)  w_out     (D, D)
#   cols [ 64: 96)  head_mask (D, D)    -- block-diagonal per-head 0/1 mask
#   cols [ 96:128)  rows 0..3: bq, b_out, ln_y_w, ln_y_b   (each (1, D))
# Band 1 (rows [32, 112)):
#   cols [  0: 64)  wkv  (L, 2D) rows [32,56) + bkv  row 56  -- LN(xf) affine folded
#   cols [ 64:128)  w_emb(E, 2D) rows [32,96) + b_emb row 96 -- "+1" of (1+scale) folded
W_COLS = 128
W_ROWS = 112
R_BAND1 = 32
C_WQ, C_WOUT, C_MASK, C_VEC = 0, 32, 64, 96
VR_BQ, VR_BOUT, VR_LNYW, VR_LNYB = 0, 1, 2, 3
C_WKV, C_WEMB = 0, 64


# ------------------------------- kernel --------------------------------------
def cross_attention_kernel(x_ref, xf_ref, emb_ref, w_ref, out_ref):
    f32, bf16 = jnp.float32, jnp.bfloat16

    # ---- parameters: one lane-dense bf16 slab, loaded once ------------------
    wq = w_ref[pl.ds(0, D), pl.ds(C_WQ, D)]                         # (D, D)   bf16
    w_out = w_ref[pl.ds(0, D), pl.ds(C_WOUT, D)]                    # (D, D)   bf16
    hmask = w_ref[pl.ds(0, D), pl.ds(C_MASK, D)]                    # (D, D)   bf16
    bq = w_ref[pl.ds(VR_BQ, 1), pl.ds(C_VEC, D)].astype(f32)        # (1, D)
    b_out = w_ref[pl.ds(VR_BOUT, 1), pl.ds(C_VEC, D)].astype(f32)
    ln_y_w = w_ref[pl.ds(VR_LNYW, 1), pl.ds(C_VEC, D)].astype(f32)
    ln_y_b = w_ref[pl.ds(VR_LNYB, 1), pl.ds(C_VEC, D)].astype(f32)
    wkv = w_ref[pl.ds(R_BAND1, L), pl.ds(C_WKV, 2 * D)]             # (L, 2D)  bf16
    bkv = w_ref[pl.ds(R_BAND1 + L, 1), pl.ds(C_WKV, 2 * D)].astype(f32)
    w_emb = w_ref[pl.ds(R_BAND1, E), pl.ds(C_WEMB, 2 * D)]          # (E, 2D)  bf16
    b_emb = w_ref[pl.ds(R_BAND1 + E, 1), pl.ds(C_WEMB, 2 * D)].astype(f32)

    x = x_ref[...]        # (B*T, D) f32
    xf = xf_ref[...]      # (B*N, L) f32
    emb = emb_ref[...]    # (B*T, E) f32  (already expanded over T in the wrapper)

    def norm(a):          # LayerNorm without affine (affine folded into the weights)
        m = jnp.mean(a, axis=-1, keepdims=True)
        v = jnp.mean(jnp.square(a - m), axis=-1, keepdims=True)
        return (a - m) * lax.rsqrt(v + EPS)

    # ---- Q projection + segmented per-head softmax (all batch rows fused) ---
    q = jnp.dot(norm(x).astype(bf16), wq, preferred_element_type=f32) + bq   # (B*T, D)
    # Global row-max is constant within every head segment -> same per-head softmax.
    q = q - jnp.max(q, axis=-1, keepdims=True)
    eq = jnp.exp(q)
    q_den = jnp.dot(eq.astype(bf16), hmask, preferred_element_type=f32)      # per-head sums
    q_soft = eq * pl.reciprocal(q_den, approx=True)                          # (B*T, D)

    # ---- fused K/V projection (all batch rows fused) ------------------------
    kv = jnp.dot(norm(xf).astype(bf16), wkv, preferred_element_type=f32) + bkv  # (B*N, 2D)
    k_all = kv[:, :D]                                                        # (B*N, D)
    v_all = kv[:, D:]                                                        # (B*N, D)

    # ---- attention: only the per-batch pieces stay in the static loop -------
    # (K's column softmax runs over each batch's own text tokens.)
    hmask_f = hmask.astype(f32)
    nb = x.shape[0] // T
    ys = []
    for b in range(nb):
        kb = k_all[b * N:(b + 1) * N, :]                                     # (N, D)
        vb = v_all[b * N:(b + 1) * N, :]                                     # (N, D)
        kb = kb - jnp.max(kb, axis=0, keepdims=True)
        ekb = jnp.exp(kb)
        kbs = ekb * pl.reciprocal(jnp.sum(ekb, axis=0, keepdims=True), approx=True)
        # attn[d, l] = sum_n k_soft[n, d] * v[n, l]; only same-head blocks are kept.
        attn = lax.dot_general(kbs.astype(bf16), vb.astype(bf16),
                               (((0,), (0,)), ((), ())),
                               preferred_element_type=f32)                   # (D, D)
        attn_m = (attn * hmask_f).astype(bf16)
        qb = q_soft[b * T:(b + 1) * T, :].astype(bf16)                       # (T, D)
        ys.append(jnp.dot(qb, attn_m, preferred_element_type=f32))           # (T, D)
    y = jnp.concatenate(ys, axis=0)                                          # (B*T, D)

    # ---- FiLM / StylizationBlock (eval mode: dropout = identity), fused -----
    e = (emb * jax.nn.sigmoid(emb)).astype(bf16)                             # SiLU(emb)
    ss = jnp.dot(e, w_emb, preferred_element_type=f32) + b_emb               # (B*T, 2D)
    scale_p1 = ss[:, :D]          # (1 + scale); the +1 was folded into b_emb on host
    shift = ss[:, D:]
    ym = jnp.mean(y, axis=-1, keepdims=True)
    yv = jnp.mean(jnp.square(y - ym), axis=-1, keepdims=True)
    yn = (y - ym) * lax.rsqrt(yv + EPS) * ln_y_w + ln_y_b
    hf = yn * scale_p1 + shift
    hf = (hf * jax.nn.sigmoid(hf)).astype(bf16)                              # SiLU
    hf = jnp.dot(hf, w_out, preferred_element_type=f32) + b_out              # (B*T, D)

    out_ref[...] = x + hf          # one contiguous (B*T, D) store


# ------------------------------- wrapper --------------------------------------
@jax.jit
def cross_attention(x, xf, emb, w_slab):
    b, t, d = x.shape
    n, l = xf.shape[1], xf.shape[2]
    e = emb.shape[-1]

    # Batch folded into the sublane (row) dimension so all LN / projections /
    # FiLM run once, full width; emb is pre-expanded over T so its matmul and the
    # FiLM scale/shift broadcast need no per-batch handling inside the kernel.
    x2 = x.reshape(b * t, d)
    xf2 = xf.reshape(b * n, l)
    emb2 = jnp.broadcast_to(emb[:, None, :], (b, t, e)).reshape(b * t, e)

    out2 = pl.pallas_call(
        cross_attention_kernel,
        out_shape=jax.ShapeDtypeStruct((b * t, d), jnp.float32),
        grid=(1,),   # tiny problem: one fused step on all chips (v5e/v6e/v7x)
        in_specs=[
            pl.BlockSpec((b * t, d), lambda i: (0, 0)),        # x  (flattened)
            pl.BlockSpec((b * n, l), lambda i: (0, 0)),        # xf (flattened)
            pl.BlockSpec((b * t, e), lambda i: (0, 0)),        # emb (expanded)
            pl.BlockSpec((W_ROWS, W_COLS), lambda i: (0, 0)),  # packed parameter slab
        ],
        out_specs=pl.BlockSpec((b * t, d), lambda i: (0, 0)),
        compiler_params=pltpu.CompilerParams(
            dimension_semantics=("arbitrary",)),
    )(x2, xf2, emb2, w_slab)
    return out2.reshape(b, t, d)


# ---------------------- parameter packing (once, outside jit) -----------------
def pack_params(p):
    """Fold + pack all 16 parameter tensors into one lane-dense bf16 slab."""
    ln_x_w = p["ln_x_w"].reshape(-1)
    ln_x_b = p["ln_x_b"].reshape(-1)
    ln_t_w = p["ln_t_w"].reshape(-1)
    ln_t_b = p["ln_t_b"].reshape(-1)

    # LayerNorm affine folded into the following Linear (LN -> Linear is affine):
    #   (xhat*g + beta) @ W + b  ==  xhat @ (diag(g) W) + (beta @ W + b)
    wq_f = ln_x_w[:, None] * p["wq"]                                  # (D, D)
    bq_f = ln_x_b @ p["wq"] + p["bq"].reshape(-1)                     # (D,)
    wkv = jnp.concatenate([p["wk"], p["wv"]], axis=1)                 # (L, 2D)
    wkv_f = ln_t_w[:, None] * wkv
    bkv_f = ln_t_b @ wkv + jnp.concatenate([p["bk"], p["bv"]], axis=1).reshape(-1)

    # FiLM "(1 + scale)": fold the +1 into the scale half of b_emb.
    b_emb_f = p["b_emb"].reshape(-1).at[:D].add(1.0)

    # Block-diagonal per-head mask (precomputed on host).
    idx = jnp.arange(D) // DH
    head_mask = (idx[:, None] == idx[None, :]).astype(jnp.float32)    # (D, D)

    slab = jnp.zeros((W_ROWS, W_COLS), jnp.float32)
    # Band 0
    slab = slab.at[0:D, C_WQ:C_WQ + D].set(wq_f)
    slab = slab.at[0:D, C_WOUT:C_WOUT + D].set(p["w_out"])
    slab = slab.at[0:D, C_MASK:C_MASK + D].set(head_mask)
    slab = slab.at[VR_BQ, C_VEC:C_VEC + D].set(bq_f)
    slab = slab.at[VR_BOUT, C_VEC:C_VEC + D].set(p["b_out"].reshape(-1))
    slab = slab.at[VR_LNYW, C_VEC:C_VEC + D].set(p["ln_y_w"].reshape(-1))
    slab = slab.at[VR_LNYB, C_VEC:C_VEC + D].set(p["ln_y_b"].reshape(-1))
    # Band 1
    slab = slab.at[R_BAND1:R_BAND1 + L, C_WKV:C_WKV + 2 * D].set(wkv_f)
    slab = slab.at[R_BAND1 + L, C_WKV:C_WKV + 2 * D].set(bkv_f)
    slab = slab.at[R_BAND1:R_BAND1 + E, C_WEMB:C_WEMB + 2 * D].set(p["w_emb"])
    slab = slab.at[R_BAND1 + E, C_WEMB:C_WEMB + 2 * D].set(b_emb_f)
    return slab.astype(jnp.bfloat16)


# --------------------------- pure-JAX reference -------------------------------
def reference(x, xf, emb, p):
    def ln(a, w, bb):
        m = a.mean(-1, keepdims=True)
        v = jnp.square(a - m).mean(-1, keepdims=True)
        return (a - m) / jnp.sqrt(v + EPS) * w.reshape(-1) + bb.reshape(-1)

    bsz, t, d = x.shape
    n = xf.shape[1]
    hi = lax.Precision.HIGHEST

    q = jnp.dot(ln(x, p["ln_x_w"], p["ln_x_b"]), p["wq"], precision=hi) + p["bq"].reshape(-1)
    xfn = ln(xf, p["ln_t_w"], p["ln_t_b"])
    k = jnp.dot(xfn, p["wk"], precision=hi) + p["bk"].reshape(-1)
    v = jnp.dot(xfn, p["wv"], precision=hi) + p["bv"].reshape(-1)

    q = jax.nn.softmax(q.reshape(bsz, t, H, -1), axis=-1)
    k = jax.nn.softmax(k.reshape(bsz, n, H, -1), axis=1)
    v = v.reshape(bsz, n, H, -1)

    attn = jnp.einsum("bnhd,bnhl->bhdl", k, v, precision=hi)
    y = jnp.einsum("bnhd,bhdl->bnhl", q, attn, precision=hi).reshape(bsz, t, d)

    e = jax.nn.silu(emb)
    eo = jnp.dot(e, p["w_emb"], precision=hi) + p["b_emb"].reshape(-1)
    scale = eo[:, :d][:, None, :]
    shift = eo[:, d:][:, None, :]
    yn = ln(y, p["ln_y_w"], p["ln_y_b"])
    h = yn * (1.0 + scale) + shift
    h = jax.nn.silu(h)
    h = jnp.dot(h, p["w_out"], precision=hi) + p["b_out"].reshape(-1)
    return x + h


# --------------------------------- main ---------------------------------------
def init_params(key):
    ks = jax.random.split(key, 16)
    s = 0.05
    return {
        "ln_x_w": 1.0 + s * jax.random.normal(ks[0], (1, D), jnp.float32),
        "ln_x_b": s * jax.random.normal(ks[1], (1, D), jnp.float32),
        "wq": s * jax.random.normal(ks[2], (D, D), jnp.float32),
        "bq": s * jax.random.normal(ks[3], (1, D), jnp.float32),
        "ln_t_w": 1.0 + s * jax.random.normal(ks[4], (1, L), jnp.float32),
        "ln_t_b": s * jax.random.normal(ks[5], (1, L), jnp.float32),
        "wk": s * jax.random.normal(ks[6], (L, D), jnp.float32),
        "bk": s * jax.random.normal(ks[7], (1, D), jnp.float32),
        "wv": s * jax.random.normal(ks[8], (L, D), jnp.float32),
        "bv": s * jax.random.normal(ks[9], (1, D), jnp.float32),
        "w_emb": s * jax.random.normal(ks[10], (E, 2 * D), jnp.float32),
        "b_emb": s * jax.random.normal(ks[11], (1, 2 * D), jnp.float32),
        "ln_y_w": 1.0 + s * jax.random.normal(ks[12], (1, D), jnp.float32),
        "ln_y_b": s * jax.random.normal(ks[13], (1, D), jnp.float32),
        # NOTE: original FiLM zero-inits the output linear; random init so the
        # kernel exercises a non-trivial path.
        "w_out": s * jax.random.normal(ks[14], (D, D), jnp.float32),
        "b_out": s * jax.random.normal(ks[15], (1, D), jnp.float32),
    }


if __name__ == "__main__":
    key = jax.random.PRNGKey(0)
    kx, kxf, kemb, kp = jax.random.split(key, 4)

    x = jax.random.normal(kx, (B, T, D), jnp.float32)
    xf = jax.random.normal(kxf, (B, N, L), jnp.float32)
    emb = jax.random.normal(kemb, (B, E), jnp.float32)
    params = init_params(kp)

    # Parameter folding/packing happens once, outside the jitted call.
    w_slab = pack_params(params)

    out = cross_attention(x, xf, emb, w_slab)
    out = jax.block_until_ready(out)

    ref = reference(x, xf, emb, params)
    assert out.shape == (B, T, D)
    max_err = jnp.max(jnp.abs(out - ref))
    # Kernel uses bf16 MXU operands + approx EUP reciprocals; reference is f32
    # Precision.HIGHEST, so allow ~2e-2 absolute slack (structural bugs would be
    # orders of magnitude larger).
    assert jnp.allclose(out, ref, rtol=1e-2, atol=2e-2), f"max abs err {max_err}"

    print("KERNEL_OK")
</pallas_src>

<mosaic_0001>
module attributes {stable_mosaic.version = 11 : i64} {
  func.func @cross_attention_kernel(%arg0: i32, %arg1: memref<16x32xf32, #tpu.memory_space<vmem>>, %arg2: memref<12x24xf32, #tpu.memory_space<vmem>>, %arg3: memref<16x64xf32, #tpu.memory_space<vmem>>, %arg4: memref<112x128xbf16, #tpu.memory_space<vmem>>, %arg5: memref<16x32xf32, #tpu.memory_space<vmem>>) attributes {dimension_semantics = [#tpu.dimension_semantics<arbitrary>], iteration_bounds = array<i64: 1>, scalar_prefetch = 0 : i64, scratch_operands = 0 : i64, tpu.core_type = #tpu.core_type<tc>, window_params = [{pipeline_mode = #tpu.pipeline_mode<synchronous>, transform_indices = @transform_0, window_bounds = array<i64: 16, 32>}, {pipeline_mode = #tpu.pipeline_mode<synchronous>, transform_indices = @transform_1, window_bounds = array<i64: 12, 24>}, {pipeline_mode = #tpu.pipeline_mode<synchronous>, transform_indices = @transform_2, window_bounds = array<i64: 16, 64>}, {pipeline_mode = #tpu.pipeline_mode<synchronous>, transform_indices = @transform_3, window_bounds = array<i64: 112, 128>}, {pipeline_mode = #tpu.pipeline_mode<synchronous>, transform_indices = @transform_4, window_bounds = array<i64: 16, 32>}]} {
    %c0 = arith.constant 0 : index
    %c0_0 = arith.constant 0 : index
    %0 = vector.load %arg4[%c0, %c0_0] : memref<112x128xbf16, #tpu.memory_space<vmem>>, vector<32x32xbf16>
    %c0_1 = arith.constant 0 : index
    %c32 = arith.constant 32 : index
    %1 = vector.load %arg4[%c0_1, %c32] : memref<112x128xbf16, #tpu.memory_space<vmem>>, vector<32x32xbf16>
    %c0_2 = arith.constant 0 : index
    %c64 = arith.constant 64 : index
    %2 = vector.load %arg4[%c0_2, %c64] : memref<112x128xbf16, #tpu.memory_space<vmem>>, vector<32x32xbf16>
    %c0_3 = arith.constant 0 : index
    %c96 = arith.constant 96 : index
    %3 = vector.load %arg4[%c0_3, %c96] : memref<112x128xbf16, #tpu.memory_space<vmem>>, vector<1x32xbf16>
    %4 = arith.extf %3 : vector<1x32xbf16> to vector<1x32xf32>
    %c1 = arith.constant 1 : index
    %c96_4 = arith.constant 96 : index
    %5 = vector.load %arg4[%c1, %c96_4] : memref<112x128xbf16, #tpu.memory_space<vmem>>, vector<1x32xbf16>
    %6 = arith.extf %5 : vector<1x32xbf16> to vector<1x32xf32>
    %c2 = arith.constant 2 : index
    %c96_5 = arith.constant 96 : index
    %7 = vector.load %arg4[%c2, %c96_5] : memref<112x128xbf16, #tpu.memory_space<vmem>>, vector<1x32xbf16>
    %8 = arith.extf %7 : vector<1x32xbf16> to vector<1x32xf32>
    %c3 = arith.constant 3 : index
    %c96_6 = arith.constant 96 : index
    %9 = vector.load %arg4[%c3, %c96_6] : memref<112x128xbf16, #tpu.memory_space<vmem>>, vector<1x32xbf16>
    %10 = arith.extf %9 : vector<1x32xbf16> to vector<1x32xf32>
    %c32_7 = arith.constant 32 : index
    %c0_8 = arith.constant 0 : index
    %11 = vector.load %arg4[%c32_7, %c0_8] : memref<112x128xbf16, #tpu.memory_space<vmem>>, vector<24x64xbf16>
    %c56 = arith.constant 56 : index
    %c0_9 = arith.constant 0 : index
    %12 = vector.load %arg4[%c56, %c0_9] : memref<112x128xbf16, #tpu.memory_space<vmem>>, vector<1x64xbf16>
    %13 = arith.extf %12 : vector<1x64xbf16> to vector<1x64xf32>
    %c32_10 = arith.constant 32 : index
    %c64_11 = arith.constant 64 : index
    %14 = vector.load %arg4[%c32_10, %c64_11] : memref<112x128xbf16, #tpu.memory_space<vmem>>, vector<64x64xbf16>
    %c96_12 = arith.constant 96 : index
    %c64_13 = arith.constant 64 : index
    %15 = vector.load %arg4[%c96_12, %c64_13] : memref<112x128xbf16, #tpu.memory_space<vmem>>, vector<1x64xbf16>
    %16 = arith.extf %15 : vector<1x64xbf16> to vector<1x64xf32>
    %c0_14 = arith.constant 0 : index
    %c0_15 = arith.constant 0 : index
    %17 = vector.load %arg1[%c0_14, %c0_15] : memref<16x32xf32, #tpu.memory_space<vmem>>, vector<16x32xf32>
    %c0_16 = arith.constant 0 : index
    %c0_17 = arith.constant 0 : index
    %18 = vector.load %arg2[%c0_16, %c0_17] : memref<12x24xf32, #tpu.memory_space<vmem>>, vector<12x24xf32>
    %c0_18 = arith.constant 0 : index
    %c0_19 = arith.constant 0 : index
    %19 = vector.load %arg3[%c0_18, %c0_19] : memref<16x64xf32, #tpu.memory_space<vmem>>, vector<16x64xf32>
    %cst = arith.constant dense<0.000000e+00> : vector<16xf32>
    %20 = vector.multi_reduction <add>, %17, %cst [1] : vector<16x32xf32> to vector<16xf32>
    %21 = vector.shape_cast %20 : vector<16xf32> to vector<16x1xf32>
    %cst_20 = arith.constant 3.200000e+01 : f32
    %22 = vector.broadcast %cst_20 : f32 to vector<16x1xf32>
    %23 = arith.divf %21, %22 : vector<16x1xf32>
    %24 = vector.broadcast %23 : vector<16x1xf32> to vector<16x32xf32>
    %25 = arith.subf %17, %24 : vector<16x32xf32>
    %26 = arith.mulf %25, %25 : vector<16x32xf32>
    %cst_21 = arith.constant dense<0.000000e+00> : vector<16xf32>
    %27 = vector.multi_reduction <add>, %26, %cst_21 [1] : vector<16x32xf32> to vector<16xf32>
    %28 = vector.shape_cast %27 : vector<16xf32> to vector<16x1xf32>
    %cst_22 = arith.constant 3.200000e+01 : f32
    %29 = vector.broadcast %cst_22 : f32 to vector<16x1xf32>
    %30 = arith.divf %28, %29 : vector<16x1xf32>
    %31 = vector.broadcast %23 : vector<16x1xf32> to vector<16x32xf32>
    %32 = arith.subf %17, %31 : vector<16x32xf32>
    %cst_23 = arith.constant 9.99999974E-6 : f32
    %33 = vector.broadcast %cst_23 : f32 to vector<16x1xf32>
    %34 = arith.addf %30, %33 : vector<16x1xf32>
    %35 = math.rsqrt %34 : vector<16x1xf32>
    %36 = vector.broadcast %35 : vector<16x1xf32> to vector<16x32xf32>
    %37 = arith.mulf %32, %36 : vector<16x32xf32>
    %38 = arith.truncf %37 : vector<16x32xf32> to vector<16x32xbf16>
    %cst_24 = arith.constant dense<0.000000e+00> : vector<16x32xf32>
    %39 = tpu.matmul %38, %0, %cst_24 {dimension_numbers = #tpu.dot_dimension_numbers<[1], [0], [0], [1], [0, 0, 1, 1], [], []>} : vector<16x32xbf16>, vector<32x32xbf16>, vector<16x32xf32> -> vector<16x32xf32>
    %40 = vector.broadcast %4 : vector<1x32xf32> to vector<16x32xf32>
    %41 = arith.addf %39, %40 : vector<16x32xf32>
    %cst_25 = arith.constant dense<0xFF800000> : vector<16xf32>
    %42 = vector.multi_reduction <maximumf>, %41, %cst_25 [1] : vector<16x32xf32> to vector<16xf32>
    %43 = vector.shape_cast %42 : vector<16xf32> to vector<16x1xf32>
    %44 = vector.broadcast %43 : vector<16x1xf32> to vector<16x32xf32>
    %45 = arith.subf %41, %44 : vector<16x32xf32>
    %46 = math.exp %45 : vector<16x32xf32>
    %47 = arith.truncf %46 : vector<16x32xf32> to vector<16x32xbf16>
    %cst_26 = arith.constant dense<0.000000e+00> : vector<16x32xf32>
    %48 = tpu.matmul %47, %2, %cst_26 {dimension_numbers = #tpu.dot_dimension_numbers<[1], [0], [0], [1], [0, 0, 1, 1], [], []>} : vector<16x32xbf16>, vector<32x32xbf16>, vector<16x32xf32> -> vector<16x32xf32>
    %49 = tpu.reciprocal %48 {approx = true} : vector<16x32xf32> -> vector<16x32xf32>
    %50 = arith.mulf %46, %49 : vector<16x32xf32>
    %cst_27 = arith.constant dense<0.000000e+00> : vector<12xf32>
    %51 = vector.multi_reduction <add>, %18, %cst_27 [1] : vector<12x24xf32> to vector<12xf32>
    %52 = vector.shape_cast %51 : vector<12xf32> to vector<12x1xf32>
    %cst_28 = arith.constant 2.400000e+01 : f32
    %53 = vector.broadcast %cst_28 : f32 to vector<12x1xf32>
    %54 = arith.divf %52, %53 : vector<12x1xf32>
    %55 = vector.broadcast %54 : vector<12x1xf32> to vector<12x24xf32>
    %56 = arith.subf %18, %55 : vector<12x24xf32>
    %57 = arith.mulf %56, %56 : vector<12x24xf32>
    %cst_29 = arith.constant dense<0.000000e+00> : vector<12xf32>
    %58 = vector.multi_reduction <add>, %57, %cst_29 [1] : vector<12x24xf32> to vector<12xf32>
    %59 = vector.shape_cast %58 : vector<12xf32> to vector<12x1xf32>
    %cst_30 = arith.constant 2.400000e+01 : f32
    %60 = vector.broadcast %cst_30 : f32 to vector<12x1xf32>
    %61 = arith.divf %59, %60 : vector<12x1xf32>
    %62 = vector.broadcast %54 : vector<12x1xf32> to vector<12x24xf32>
    %63 = arith.subf %18, %62 : vector<12x24xf32>
    %cst_31 = arith.constant 9.99999974E-6 : f32
    %64 = vector.broadcast %cst_31 : f32 to vector<12x1xf32>
    %65 = arith.addf %61, %64 : vector<12x1xf32>
    %66 = math.rsqrt %65 : vector<12x1xf32>
    %67 = vector.broadcast %66 : vector<12x1xf32> to vector<12x24xf32>
    %68 = arith.mulf %63, %67 : vector<12x24xf32>
    %69 = arith.truncf %68 : vector<12x24xf32> to vector<12x24xbf16>
    %cst_32 = arith.constant dense<0.000000e+00> : vector<12x64xf32>
    %70 = tpu.matmul %69, %11, %cst_32 {dimension_numbers = #tpu.dot_dimension_numbers<[1], [0], [0], [1], [0, 0, 1, 1], [], []>} : vector<12x24xbf16>, vector<24x64xbf16>, vector<12x64xf32> -> vector<12x64xf32>
    %71 = vector.broadcast %13 : vector<1x64xf32> to vector<12x64xf32>
    %72 = arith.addf %70, %71 : vector<12x64xf32>
    %73 = vector.extract_strided_slice %72 {offsets = [0, 0], sizes = [12, 32], strides = [1, 1]} : vector<12x64xf32> to vector<12x32xf32>
    %74 = vector.extract_strided_slice %72 {offsets = [0, 32], sizes = [12, 32], strides = [1, 1]} : vector<12x64xf32> to vector<12x32xf32>
    %75 = arith.extf %2 : vector<32x32xbf16> to vector<32x32xf32>
    %76 = vector.extract_strided_slice %73 {offsets = [0, 0], sizes = [6, 32], strides = [1, 1]} : vector<12x32xf32> to vector<6x32xf32>
    %77 = vector.extract_strided_slice %74 {offsets = [0, 0], sizes = [6, 32], strides = [1, 1]} : vector<12x32xf32> to vector<6x32xf32>
    %cst_33 = arith.constant dense<0xFF800000> : vector<32xf32>
    %78 = vector.multi_reduction <maximumf>, %76, %cst_33 [0] : vector<6x32xf32> to vector<32xf32>
    %79 = vector.shape_cast %78 : vector<32xf32> to vector<1x32xf32>
    %80 = vector.broadcast %79 : vector<1x32xf32> to vector<6x32xf32>
    %81 = arith.subf %76, %80 : vector<6x32xf32>
    %82 = math.exp %81 : vector<6x32xf32>
    %cst_34 = arith.constant dense<0.000000e+00> : vector<32xf32>
    %83 = vector.multi_reduction <add>, %82, %cst_34 [0] : vector<6x32xf32> to vector<32xf32>
    %84 = vector.shape_cast %83 : vector<32xf32> to vector<1x32xf32>
    %85 = tpu.reciprocal %84 {approx = true} : vector<1x32xf32> -> vector<1x32xf32>
    %86 = vector.broadcast %85 : vector<1x32xf32> to vector<6x32xf32>
    %87 = arith.mulf %82, %86 : vector<6x32xf32>
    %88 = arith.truncf %87 : vector<6x32xf32> to vector<6x32xbf16>
    %89 = arith.truncf %77 : vector<6x32xf32> to vector<6x32xbf16>
    %cst_35 = arith.constant dense<0.000000e+00> : vector<32x32xf32>
    %90 = tpu.matmul %88, %89, %cst_35 {dimension_numbers = #tpu.dot_dimension_numbers<[0], [0], [1], [1], [0, 1, 1, 1], [], []>} : vector<6x32xbf16>, vector<6x32xbf16>, vector<32x32xf32> -> vector<32x32xf32>
    %91 = arith.mulf %90, %75 : vector<32x32xf32>
    %92 = arith.truncf %91 : vector<32x32xf32> to vector<32x32xbf16>
    %93 = vector.extract_strided_slice %50 {offsets = [0, 0], sizes = [8, 32], strides = [1, 1]} : vector<16x32xf32> to vector<8x32xf32>
    %94 = arith.truncf %93 : vector<8x32xf32> to vector<8x32xbf16>
    %cst_36 = arith.constant dense<0.000000e+00> : vector<8x32xf32>
    %95 = tpu.matmul %94, %92, %cst_36 {dimension_numbers = #tpu.dot_dimension_numbers<[1], [0], [0], [1], [0, 0, 1, 1], [], []>} : vector<8x32xbf16>, vector<32x32xbf16>, vector<8x32xf32> -> vector<8x32xf32>
    %96 = vector.extract_strided_slice %73 {offsets = [6, 0], sizes = [6, 32], strides = [1, 1]} : vector<12x32xf32> to vector<6x32xf32>
    %97 = vector.extract_strided_slice %74 {offsets = [6, 0], sizes = [6, 32], strides = [1, 1]} : vector<12x32xf32> to vector<6x32xf32>
    %cst_37 = arith.constant dense<0xFF800000> : vector<32xf32>
    %98 = vector.multi_reduction <maximumf>, %96, %cst_37 [0] : vector<6x32xf32> to vector<32xf32>
    %99 = vector.shape_cast %98 : vector<32xf32> to vector<1x32xf32>
    %100 = vector.broadcast %99 : vector<1x32xf32> to vector<6x32xf32>
    %101 = arith.subf %96, %100 : vector<6x32xf32>
    %102 = math.exp %101 : vector<6x32xf32>
    %cst_38 = arith.constant dense<0.000000e+00> : vector<32xf32>
    %103 = vector.multi_reduction <add>, %102, %cst_38 [0] : vector<6x32xf32> to vector<32xf32>
    %104 = vector.shape_cast %103 : vector<32xf32> to vector<1x32xf32>
    %105 = tpu.reciprocal %104 {approx = true} : vector<1x32xf32> -> vector<1x32xf32>
    %106 = vector.broadcast %105 : vector<1x32xf32> to vector<6x32xf32>
    %107 = arith.mulf %102, %106 : vector<6x32xf32>
    %108 = arith.truncf %107 : vector<6x32xf32> to vector<6x32xbf16>
    %109 = arith.truncf %97 : vector<6x32xf32> to vector<6x32xbf16>
    %cst_39 = arith.constant dense<0.000000e+00> : vector<32x32xf32>
    %110 = tpu.matmul %108, %109, %cst_39 {dimension_numbers = #tpu.dot_dimension_numbers<[0], [0], [1], [1], [0, 1, 1, 1], [], []>} : vector<6x32xbf16>, vector<6x32xbf16>, vector<32x32xf32> -> vector<32x32xf32>
    %111 = arith.mulf %110, %75 : vector<32x32xf32>
    %112 = arith.truncf %111 : vector<32x32xf32> to vector<32x32xbf16>
    %113 = vector.extract_strided_slice %50 {offsets = [8, 0], sizes = [8, 32], strides = [1, 1]} : vector<16x32xf32> to vector<8x32xf32>
    %114 = arith.truncf %113 : vector<8x32xf32> to vector<8x32xbf16>
    %cst_40 = arith.constant dense<0.000000e+00> : vector<8x32xf32>
    %115 = tpu.matmul %114, %112, %cst_40 {dimension_numbers = #tpu.dot_dimension_numbers<[1], [0], [0], [1], [0, 0, 1, 1], [], []>} : vector<8x32xbf16>, vector<32x32xbf16>, vector<8x32xf32> -> vector<8x32xf32>
    %116 = tpu.concatenate %95, %115 in 0 : vector<8x32xf32>, vector<8x32xf32> -> vector<16x32xf32>
    %117 = arith.negf %19 : vector<16x64xf32>
    %118 = math.exp %117 : vector<16x64xf32>
    %cst_41 = arith.constant 1.000000e+00 : f32
    %119 = vector.broadcast %cst_41 : f32 to vector<16x64xf32>
    %120 = arith.addf %119, %118 : vector<16x64xf32>
    %121 = arith.divf %119, %120 : vector<16x64xf32>
    %122 = arith.mulf %19, %121 : vector<16x64xf32>
    %123 = arith.truncf %122 : vector<16x64xf32> to vector<16x64xbf16>
    %cst_42 = arith.constant dense<0.000000e+00> : vector<16x64xf32>
    %124 = tpu.matmul %123, %14, %cst_42 {dimension_numbers = #tpu.dot_dimension_numbers<[1], [0], [0], [1], [0, 0, 1, 1], [], []>} : vector<16x64xbf16>, vector<64x64xbf16>, vector<16x64xf32> -> vector<16x64xf32>
    %125 = vector.broadcast %16 : vector<1x64xf32> to vector<16x64xf32>
    %126 = arith.addf %124, %125 : vector<16x64xf32>
    %127 = vector.extract_strided_slice %126 {offsets = [0, 0], sizes = [16, 32], strides = [1, 1]} : vector<16x64xf32> to vector<16x32xf32>
    %128 = vector.extract_strided_slice %126 {offsets = [0, 32], sizes = [16, 32], strides = [1, 1]} : vector<16x64xf32> to vector<16x32xf32>
    %cst_43 = arith.constant dense<0.000000e+00> : vector<16xf32>
    %129 = vector.multi_reduction <add>, %116, %cst_43 [1] : vector<16x32xf32> to vector<16xf32>
    %130 = vector.shape_cast %129 : vector<16xf32> to vector<16x1xf32>
    %cst_44 = arith.constant 3.200000e+01 : f32
    %131 = vector.broadcast %cst_44 : f32 to vector<16x1xf32>
    %132 = arith.divf %130, %131 : vector<16x1xf32>
    %133 = vector.broadcast %132 : vector<16x1xf32> to vector<16x32xf32>
    %134 = arith.subf %116, %133 : vector<16x32xf32>
    %135 = arith.mulf %134, %134 : vector<16x32xf32>
    %cst_45 = arith.constant dense<0.000000e+00> : vector<16xf32>
    %136 = vector.multi_reduction <add>, %135, %cst_45 [1] : vector<16x32xf32> to vector<16xf32>
    %137 = vector.shape_cast %136 : vector<16xf32> to vector<16x1xf32>
    %cst_46 = arith.constant 3.200000e+01 : f32
    %138 = vector.broadcast %cst_46 : f32 to vector<16x1xf32>
    %139 = arith.divf %137, %138 : vector<16x1xf32>
    %140 = vector.broadcast %132 : vector<16x1xf32> to vector<16x32xf32>
    %141 = arith.subf %116, %140 : vector<16x32xf32>
    %cst_47 = arith.constant 9.99999974E-6 : f32
    %142 = vector.broadcast %cst_47 : f32 to vector<16x1xf32>
    %143 = arith.addf %139, %142 : vector<16x1xf32>
    %144 = math.rsqrt %143 : vector<16x1xf32>
    %145 = vector.broadcast %144 : vector<16x1xf32> to vector<16x32xf32>
    %146 = arith.mulf %141, %145 : vector<16x32xf32>
    %147 = vector.broadcast %8 : vector<1x32xf32> to vector<16x32xf32>
    %148 = arith.mulf %146, %147 : vector<16x32xf32>
    %149 = vector.broadcast %10 : vector<1x32xf32> to vector<16x32xf32>
    %150 = arith.addf %148, %149 : vector<16x32xf32>
    %151 = arith.mulf %150, %127 : vector<16x32xf32>
    %152 = arith.addf %151, %128 : vector<16x32xf32>
    %153 = arith.negf %152 : vector<16x32xf32>
    %154 = math.exp %153 : vector<16x32xf32>
    %cst_48 = arith.constant 1.000000e+00 : f32
    %155 = vector.broadcast %cst_48 : f32 to vector<16x32xf32>
    %156 = arith.addf %155, %154 : vector<16x32xf32>
    %157 = arith.divf %155, %156 : vector<16x32xf32>
    %158 = arith.mulf %152, %157 : vector<16x32xf32>
    %159 = arith.truncf %158 : vector<16x32xf32> to vector<16x32xbf16>
    %cst_49 = arith.constant dense<0.000000e+00> : vector<16x32xf32>
    %160 = tpu.matmul %159, %1, %cst_49 {dimension_numbers = #tpu.dot_dimension_numbers<[1], [0], [0], [1], [0, 0, 1, 1], [], []>} : vector<16x32xbf16>, vector<32x32xbf16>, vector<16x32xf32> -> vector<16x32xf32>
    %161 = vector.broadcast %6 : vector<1x32xf32> to vector<16x32xf32>
    %162 = arith.addf %160, %161 : vector<16x32xf32>
    %163 = arith.addf %17, %162 : vector<16x32xf32>
    %c0_50 = arith.constant 0 : index
    %c0_51 = arith.constant 0 : index
    %164 = vector.load %arg5[%c0_50, %c0_51] : memref<16x32xf32, #tpu.memory_space<vmem>>, vector<16x32xf32>
    tpu.vector_store %arg5[%c0_50, %c0_51], %163 {strides = array<i32>} : memref<16x32xf32, #tpu.memory_space<vmem>>, vector<16x32xf32>,
    return
  }
  func.func @transform_0(%arg0: i32) -> (i32, i32) {
    %c0_i32 = arith.constant 0 : i32
    %c0_i32_0 = arith.constant 0 : i32
    %c0_i32_1 = arith.constant 0 : i32
    return %c0_i32, %c0_i32_0 : i32, i32
  }
  func.func @transform_1(%arg0: i32) -> (i32, i32) {
    %c0_i32 = arith.constant 0 : i32
    %c0_i32_0 = arith.constant 0 : i32
    %c0_i32_1 = arith.constant 0 : i32
    return %c0_i32, %c0_i32_0 : i32, i32
  }
  func.func @transform_2(%arg0: i32) -> (i32, i32) {
    %c0_i32 = arith.constant 0 : i32
    %c0_i32_0 = arith.constant 0 : i32
    %c0_i32_1 = arith.constant 0 : i32
    return %c0_i32, %c0_i32_0 : i32, i32
  }
  func.func @transform_3(%arg0: i32) -> (i32, i32) {
    %c0_i32 = arith.constant 0 : i32
    %c0_i32_0 = arith.constant 0 : i32
    %c0_i32_1 = arith.constant 0 : i32
    return %c0_i32, %c0_i32_0 : i32, i32
  }
  func.func @transform_4(%arg0: i32) -> (i32, i32) {
    %c0_i32 = arith.constant 0 : i32
    %c0_i32_0 = arith.constant 0 : i32
    %c0_i32_1 = arith.constant 0 : i32
    return %c0_i32, %c0_i32_0 : i32, i32
  }
}

</mosaic_0001>

<bundles_post_ra>
// kernel: cross_attention.1
= control target key start
LH: loop header
LB: loop body
LE: loop exit
PB: predicated region body
PF: predicated region fallthrough
CT: control target
= control target key end

     0   :  { %vm172_vm0 = vcmask 195584   ;;  %vm45_vm1 = vcmask 261120   ;;  %s1099_s0 = inlined_call_operand.vmem [shape: f32[16,32], index: 0, kind: input, shape index: {}]   ;;  %s1100_s1 = inlined_call_operand.vmem [shape: f32[12,24], index: 1, kind: input, shape index: {}]   ;;  %s1101_s2 = inlined_call_operand.vmem [shape: f32[16,64], index: 2, kind: input, shape index: {}]   ;;  %s1102_s3 = inlined_call_operand.vmem [shape: bf16[112,128], index: 3, kind: input, shape index: {}]   ;;  %s1103_s4 = inlined_call_operand.hbm [shape: f32[16,32], index: 4, kind: output, shape index: {}]  }
   0x1   :  { %v41_v0 = vld [vmem:[%s1100_s1] sm:$0xff] }
   0x2   :  { %v920_v1 = vld [vmem:[%s1099_s0] sm:$0xff]  ;;  %v173_v2 = vsel %vm172_vm0, %v41_v0, 0.0 }
   0x3   :  { %v46_v3 = vsel %vm45_vm1, %v920_v1, 0.0  ;;  %174 = vadd.xlane.f32.xlu0 %v173_v2 }
   0x4   :  { %47 = vadd.xlane.f32.xlu1 %v46_v3 }
   0x5   :  { %9 = vsyncpa [#allocation3], 0  ;;  %v42_v4 = vld [vmem:[%s1100_s1 + $0x8] sm:$0xf]  ;;  %vm176_vm2 = vcmask 191488   ;;  %v881_v8 = vmov 24.0  }
   0x6   :  { %v931_v5 = vld [vmem:[%s1099_s0 + $0x8] sm:$0xff]  ;;  %v177_v6 = vsel %vm176_vm2, %v42_v4, 0.0  ;;  %805 = vrcp.f32 %v881_v8  ;;  %v882_v9 = vmov 32.0   ;;  %v965_v42 = vld [vmem:[%s1102_s3 + $0x18] sm:$0xff]   ;;  %vm239_vm5 = vcmask 1043456   ;;  %v977_v47 = vld [vmem:[%s1102_s3] sm:$0xff] }
   0x7   :  { %v49_v7 = vsel %vm45_vm1, %v931_v5, 0.0  ;;  %807 = vrcp.f32 %v882_v9  ;;  %v773_v43 = vunpack.c.l.b16 %v965_v42  ;;  %v971_v45 = vld [vmem:[%s1102_s3 + $0x8] sm:$0xff]  ;;  %v982_v48 = vld [vmem:[%s1102_s3 + $0x10] sm:$0xff]  ;;  %v990_v55 = vld [vmem:[%s1102_s3] sm:$0x1]  ;;  %s883_s5 = smov 32  }
   0x8   :  { %124 = vmatpush.bf16.msra.mxu0 %v971_v45  ;;  %v24_v56 = vunpack.c.l.bf16 %v990_v55  ;;  %s884_s8 = smov 96   ;;  %s885_s9 = smov 64  }
   0x9   :  { %v234_v44 = vpack.c.b16 %v773_v43, %v773_v43  ;;  %v30_v43 = vld [vmem:[%s1102_s3 + $0x1c] sm:$0x1]  ;;  %s719_s26 = sshll.u32 %s1103_s4, 4  ;;  %s887_s27 = smov 128   ;;  %s720_s26 = int_to_ptr.hbm [resolvable:$true] %s719_s26 }
   0xa   :  { %v98_v57 = vperm.slane %v24_v56, 0  ;;  %s888_s28 = smov 8  }
   0xb   :  { %178 = vadd.xlane.f32.xlu0 %v177_v6  ;;  %v241_v46 = vsel %vm239_vm5, %v234_v44, 0  ;;  %vm373_vm5 = vcmask 257024  }
   0xc   :  { %50 = vadd.xlane.f32.xlu1 %v49_v7  ;;  %v806_v10 = vpop.eup %805  ;;  %249 = vmatpush.bf16.msra.mxu2 %v241_v46  ;;  %v31_v46 = vunpack.c.l.bf16 %v30_v43 }
   0xd   :  { %v808_v11 = vpop.eup %807  ;;  %v181_v12 = vmul.f32 24.0, %v806_v10  ;;  %vm185_vm3 = vweird.f32 %v806_v10  ;;  %125 = vmatpush.bf16.msra.mxu0 %v977_v47 }
   0xe   :  { %v53_v13 = vmul.f32 32.0, %v808_v11  ;;  %vm57_vm4 = vweird.f32 %v808_v11 }
   0xf   :  { %v182_v14 = vsub.f32 1.0, %v181_v12 }
  0x10   :  { %v54_v15 = vsub.f32 1.0, %v53_v13  ;;  %250 = vmatpush.bf16.msra.mxu2 %v982_v48 }
  0x11   :  { %v183_v16 = vmul.f32 %v806_v10, %v182_v14 }
  0x12   :  { %v55_v17 = vmul.f32 %v808_v11, %v54_v15 }
  0x13   :  { %v184_v18 = vadd.f32 %v806_v10, %v183_v16 }
  0x14   :  { %v56_v19 = vadd.f32 %v808_v11, %v55_v17 }
  0x15   :  { %v186_v20 = vsel %vm185_vm3, %v806_v10, %v184_v18 }
  0x16   :  { %v936_v21 = vsel %vm57_vm4, %v808_v11, %v56_v19  ;;  %vm261_vm4 = vcmask 259072  }
  0x76   :  { %v175_v22 = vpop.xlane.xlu0 %174 }
  0x77   :  { %v48_v23 = vpop.xlane.xlu1 %47  ;;  %v187_v24 = vmul.f32 %v186_v20, %v175_v22 }
  0x78   :  { %v59_v25 = vmul.f32 %v936_v21, %v48_v23 }
  0x79   :  { %v939_v26 = vsub.f32 %v41_v0, %v187_v24 }
  0x7a   :  { %v942_v27 = vsub.f32 %v920_v1, %v59_v25 }
  0x7b   :  { %v191_v28 = vmul.f32 %v939_v26, %v939_v26 }
  0x7c   :  { %v63_v29 = vmul.f32 %v942_v27, %v942_v27 }
  0x7d   :  { %v193_v30 = vsel %vm172_vm0, %v191_v28, 0.0 }
  0x7e   :  { %v65_v31 = vsel %vm45_vm1, %v63_v29, 0.0  ;;  %194 = vadd.xlane.f32.xlu2 %v193_v30  ;;  %v179_v32 = vpop.xlane.xlu0 %178 }
  0x7f   :  { %66 = vadd.xlane.f32.xlu0 %v65_v31  ;;  %v51_v33 = vpop.xlane.xlu1 %50  ;;  %v188_v34 = vmul.f32 %v186_v20, %v179_v32 }
  0x80   :  { %v60_v35 = vmul.f32 %v936_v21, %v51_v33 }
  0x81   :  { %v951_v36 = vsub.f32 %v42_v4, %v188_v34 }
  0x82   :  { %v954_v37 = vsub.f32 %v931_v5, %v60_v35 }
  0x83   :  { %v192_v38 = vmul.f32 %v951_v36, %v951_v36 }
  0x84   :  { %v64_v39 = vmul.f32 %v954_v37, %v954_v37 }
  0x85   :  { %v196_v40 = vsel %vm176_vm2, %v192_v38, 0.0 }
  0x86   :  { %v68_v41 = vsel %vm45_vm1, %v64_v39, 0.0  ;;  %197 = vadd.xlane.f32.xlu2 %v196_v40 }
  0x87   :  { %69 = vadd.xlane.f32.xlu1 %v68_v41 }
  0x9e   :  { %112 = vrot.lane.b32.xlu2 %v98_v57, %s883_s5 }
  0xf1   :  { %v195_v49 = vpop.xlane.xlu2 %194 }
  0xf2   :  { %v67_v50 = vpop.xlane.xlu0 %66  ;;  %v199_v51 = vmul.f32 %v195_v49, %v186_v20 }
  0xf3   :  { %v71_v52 = vmul.f32 %v67_v50, %v936_v21 }
  0xf4   :  { %v201_v53 = vadd.f32 1e-05, %v199_v51 }
  0xf5   :  { %v73_v54 = vadd.f32 1e-05, %v71_v52 }
  0xf6   :  { %809 = vrsqrt.f32 %v201_v53  ;;  %vm209_vm11 = vweird.f32 %v201_v53 }
  0xf7   :  { %811 = vrsqrt.f32 %v73_v54  ;;  %vm81_vm6 = vweird.f32 %v73_v54 }
  0xf9   :  { %v198_v58 = vpop.xlane.xlu2 %197 }
  0xfa   :  { %v70_v59 = vpop.xlane.xlu1 %69  ;;  %v200_v60 = vmul.f32 %v198_v58, %v186_v20 }
  0xfb   :  { %v72_v61 = vmul.f32 %v70_v59, %v936_v21 }
  0xfc   :  { %v810_v62 = vpop.eup %809  ;;  %v202_v63 = vadd.f32 1e-05, %v200_v60 }
  0xfd   :  { %v74_v0 = vadd.f32 1e-05, %v72_v61  ;;  %v812_v2 = vpop.eup %811  ;;  %v204_v3 = vmul.f32 %v810_v62, %v201_v53  ;;  %vm210_vm8 = vweird.f32 %v810_v62 }
  0xfe   :  { %v76_v4 = vmul.f32 %v812_v2, %v73_v54  ;;  %813 = vrsqrt.f32 %v202_v63  ;;  %vm82_vm7 = vweird.f32 %v812_v2  ;;  %vm211_vm14 = vmor %vm209_vm11, %vm210_vm8  ;;  %vm219_vm15 = vweird.f32 %v202_v63 }
  0xff   :  { %v205_v6 = vmul.f32 %v810_v62, %v204_v3  ;;  %815 = vrsqrt.f32 %v74_v0  ;;  %vm91_vm9 = vweird.f32 %v74_v0  ;;  %vm997_vm12 = vmor %vm81_vm6, %vm82_vm7  ;;  %vm390_vm6 = vcmask 1041408  }
 0x100   :  { %v77_v7 = vmul.f32 %v812_v2, %v76_v4  ;;  %vm309_vm7 = vcmask 1042432   ;;  %vm302_vm8 = vcmask 48128  }
 0x101   :  { %v206_v8 = vmul.f32 0.5, %v205_v6  ;;  %v113_v44 = vpop.permute.xlu2 %112 }
 0x102   :  { %v78_v9 = vmul.f32 0.5, %v77_v7 }
 0x103   :  { %v207_v12 = vsub.f32 1.5, %v206_v8 }
 0x104   :  { %v814_v10 = vpop.eup %813  ;;  %v79_v14 = vsub.f32 1.5, %v78_v9 }
 0x105   :  { %v816_v11 = vpop.eup %815  ;;  %v214_v13 = vmul.f32 %v814_v10, %v202_v63  ;;  %v208_v18 = vmul.f32 %v810_v62, %v207_v12  ;;  %vm220_vm13 = vweird.f32 %v814_v10 }
 0x106   :  { %v86_v15 = vmul.f32 %v816_v11, %v74_v0  ;;  %v80_v20 = vmul.f32 %v812_v2, %v79_v14  ;;  %vm92_vm10 = vweird.f32 %v816_v11  ;;  %vm221_vm3 = vmor %vm219_vm15, %vm220_vm13 }
 0x107   :  { %v215_v16 = vmul.f32 %v814_v10, %v214_v13  ;;  %vm93_vm2 = vmor %vm91_vm9, %vm92_vm10  ;;  %v212_v29 = vsel %vm211_vm14, %v810_v62, %v208_v18 }
 0x108   :  { %v87_v17 = vmul.f32 %v816_v11, %v86_v15  ;;  %v84_v31 = vsel %vm997_vm12, %v812_v2, %v80_v20  ;;  %v223_v34 = vmul.f32 %v212_v29, %v939_v26 }
 0x109   :  { %v216_v19 = vmul.f32 0.5, %v215_v16  ;;  %v95_v38 = vmul.f32 %v84_v31, %v942_v27 }
 0x10a   :  { %v88_v22 = vmul.f32 0.5, %v87_v17 }
 0x10b   :  { %v217_v24 = vsub.f32 1.5, %v216_v19 }
 0x10c   :  { %v89_v25 = vsub.f32 1.5, %v88_v22 }
 0x10d   :  { %v218_v28 = vmul.f32 %v814_v10, %v217_v24 }
 0x10e   :  { %v90_v30 = vmul.f32 %v816_v11, %v89_v25 }
 0x10f   :  { %v222_v32 = vsel %vm221_vm3, %v814_v10, %v218_v28  ;;  %vm552_vm3 = vcmask 523264  }
 0x110   :  { %v94_v33 = vsel %vm93_vm2, %v816_v11, %v90_v30  ;;  %v224_v35 = vmul.f32 %v222_v32, %v951_v36  ;;  %v226_v36 = vperm.slane %v31_v46, 0 }
 0x111   :  { %v96_v39 = vmul.f32 %v94_v33, %v954_v37 }
 0x112   :  { %v225_v40 = vpack.c.bf16 %v224_v35, %v223_v34 }
 0x113   :  { %v97_v41 = vpack.c.bf16 %v96_v39, %v95_v38 }
 0x114   :  { %745 = vmatmul.msk.bf16.vlgmr.msra.gmra.mxu2 %vm172_vm0, %v225_v40  ;;  %vm371_vm0 = vcmask 261126  }
 0x115   :  { %739 = vmatmul.msk.bf16.vlgmr.msra.gmra.mxu0 %vm45_vm1, %v97_v41 }
 0x192   :  { %v127_v49 = vpop.f32.mrf.mxu0 }
 0x193   :  { %v1012_v26 = vadd.f32 %v127_v49, %v113_v44 }
 0x195   :  { %v132_v27 = vsel %vm45_vm1, %v1012_v26, -inf }
 0x196   :  { %133 = vmax.xlane.f32.xlu0 %v132_v27 }
 0x197   :  { %v252_v37 = vpop.f32.mrf.mxu2 }
 0x198   :  { %v253_v50 = vadd.f32 %v252_v37, %v226_v36 }
 0x19a   :  { %v262_v51 = vsel %vm261_vm4, %v253_v50, -inf  ;;  %v129_v52 = vpop.f32.mrf.mxu0  ;;  %v282_v53 = vpack.c.bf16 %v253_v50, %v253_v50  ;;  %v372_v0 = vsel %vm371_vm0, %v253_v50, -inf }
 0x19b   :  { %v263_v54 = vrot.slane %v262_v51, 4  ;;  %v1017_v57 = vadd.f32 %v129_v52, %v113_v44 }
 0x19c   :  { %300 = vrot.lane.b32.xlu2 %v282_v53, %s884_s8 }
 0x19d   :  { %v135_v58 = vsel %vm45_vm1, %v1017_v57, -inf  ;;  %v264_v59 = vmax.f32 %v262_v51, %v263_v54 }
 0x19e   :  { %136 = vmax.xlane.f32.xlu1 %v135_v58 }
 0x19f   :  { %v254_v60 = vpop.f32.mrf.mxu2  ;;  %v265_v61 = vrot.slane %v264_v59, 2 }
 0x1a0   :  { %v255_v62 = vadd.f32 %v254_v60, %v226_v36 }
 0x1a1   :  { %v266_v63 = vmax.f32 %v264_v59, %v265_v61 }
 0x1a2   :  { %v374_v2 = vsel %vm373_vm5, %v255_v62, -inf  ;;  %v406_v3 = vpack.c.bf16 %v255_v62, %v253_v50 }
 0x1a3   :  { %v375_v4 = vmax.f32 %v372_v0, %v374_v2  ;;  %v267_v6 = vrot.slane %v266_v63, 1 }
 0x1a4   :  { %v427_v7 = vrot.slane %v406_v3, 3 }
 0x1a5   :  { %v376_v8 = vrot.slane %v375_v4, 4  ;;  %v268_v9 = vmax.f32 %v266_v63, %v267_v6 }
 0x1a6   :  { %428 = vrot.lane.b32.xlu2 %v427_v7, %s884_s8 }
 0x1a7   :  { %v377_v10 = vmax.f32 %v375_v4, %v376_v8  ;;  %v269_v11 = vsub.f32 %v253_v50, %v268_v9 }
 0x1a9   :  { %v378_v12 = vrot.slane %v377_v10, 2  ;;  %v270_v13 = vmul.f32 1.442695, %v269_v11 }
 0x1aa   :  { %147 = vrot.lane.b32.xlu0 %v971_v45, %s885_s9 }
 0x1ab   :  { %v379_v14 = vmax.f32 %v377_v10, %v378_v12  ;;  %817 = vpow2.f32 %v270_v13 }
 0x1ad   :  { %v380_v15 = vrot.slane %v379_v14, 1 }
 0x1af   :  { %v381_v16 = vmax.f32 %v379_v14, %v380_v15 }
 0x1b1   :  { %v818_v17 = vpop.eup %817  ;;  %v382_v18 = vsub.f32 %v253_v50, %v381_v16  ;;  %v383_v19 = vsub.f32 %v255_v62, %v381_v16  ;;  %v21_v16 = vld [vmem:[%s1102_s3 + $0x8] sm:$0xff]  }
 0x1b2   :  { %v272_v20 = vsel %vm261_vm4, %v818_v17, 0.0 }
 0x1b3   :  { %v384_v22 = vmul.f32 1.442695, %v382_v18  ;;  %v386_v23 = vmul.f32 1.442695, %v383_v19  ;;  %v273_v24 = vrot.slane %v272_v20, 4  ;;  %v260_v18 = vunpack.c.h.bf16 %v21_v16 }
 0x1b5   :  { %819 = vpow2.f32 %v384_v22  ;;  %v274_v25 = vadd.f32 %v273_v24, %v272_v20 }
 0x1b6   :  { %821 = vpow2.f32 %v386_v23 }
 0x1b7   :  { %145 = vrot.lane.b32.xlu1 %v977_v47, %s885_s9  ;;  %v275_v29 = vrot.slane %v274_v25, 2 }
 0x1b9   :  { %v276_v34 = vadd.f32 %v275_v29, %v274_v25  ;;  %v770_v29 = vld [vmem:[%s1102_s3 + $0x28] sm:$0xff] }
 0x1bb   :  { %v820_v28 = vpop.eup %819  ;;  %v277_v39 = vrot.slane %v276_v34, 1 }
 0x1bc   :  { %v822_v30 = vpop.eup %821  ;;  %v391_v31 = vrot.slane %v820_v28, 6 }
 0x1bd   :  { %v392_v32 = vrot.slane %v822_v30, 6  ;;  %v278_v43 = vadd.f32 %v277_v39, %v276_v34 }
 0x1bf   :  { %v393_v33 = vsel %vm390_vm6, %v391_v31, %v392_v32  ;;  %823 = vrcp.f32 %v278_v43 }
 0x1c0   :  { %v395_v35 = vsel %vm261_vm4, %v393_v33, 0.0 }
 0x1c1   :  { %v396_v38 = vrot.slane %v395_v35, 4 }
 0x1c3   :  { %v397_v40 = vadd.f32 %v396_v38, %v395_v35 }
 0x1c5   :  { %v398_v41 = vrot.slane %v397_v40, 2  ;;  %v824_v36 = vpop.eup %823 }
 0x1c6   :  { %v280_v37 = vmul.f32 %v824_v36, %v818_v17  ;;  %v259_v17 = vunpack.c.l.bf16 %v21_v16 }
 0x1c7   :  { %v399_v44 = vadd.f32 %v398_v41, %v397_v40 }
 0x1c8   :  { %v281_v53 = vpack.c.bf16 %v280_v37, %v280_v37  ;;  %v790_v19 = vpack.i.bf16 %v260_v18, %v259_v17 }
 0x1c9   :  { %v400_v46 = vrot.slane %v399_v44, 1 }
 0x1ca   :  { %791 = vrot.lane.b32.xlu2 %v790_v19, %s885_s9 }
 0x1cb   :  { %v401_v49 = vadd.f32 %v400_v46, %v399_v44 }
 0x1cd   :  { %825 = vrcp.f32 %v401_v49 }
 0x1d2   :  { %542 = vrot.lane.b32.xlu2 %v770_v29, %s885_s9 }
 0x1d3   :  { %v826_v27 = vpop.eup %825 }
 0x1d4   :  { %v403_v50 = vmul.f32 %v826_v27, %v820_v28  ;;  %v404_v51 = vmul.f32 %v826_v27, %v822_v30  ;;  %v769_v28 = vld [vmem:[%s1102_s3 + $0x20] sm:$0xff] }
 0x1d6   :  { %v405_v52 = vpack.c.bf16 %v404_v51, %v403_v50 }
 0x1d8   :  { %v408_v54 = vrot.slane %v405_v52, 3 }
 0x1da   :  { %785 = vxpose.binary.xlu0.c.b16.start.end [1/2] (short) (narrow) %v408_v54, %v281_v53, 32 }
 0x1db   :  { %538 = vrot.lane.b32.xlu2 %v965_v42, %s885_s9 }
 0x1f6   :  { %v301_v58 = vpop.permute.xlu2 %300 }
 0x1f7   :  { %v311_v59 = vsel %vm309_vm7, %v301_v58, 0 }
 0x1f8   :  { %320 = vmatpush.bf16.msra.mxu3 %v311_v59 }
 0x200   :  { %v429_v4 = vpop.permute.xlu2 %428 }
 0x201   :  { %v437_v9 = vsel %vm309_vm7, %v429_v4, 0 }
 0x209   :  { %v134_v60 = vpop.xlane.xlu0 %133 }
 0x20a   :  { %v138_v63 = vsub.f32 %v1012_v26, %v134_v60  ;;  %v19_v26 = vld [vmem:[%s1102_s3] sm:$0xff]  }
 0x20b   :  { %v258_v11 = vunpack.c.h.bf16 %v19_v26 }
 0x20c   :  { %v140_v3 = vmul.f32 1.442695, %v138_v63 }
 0x211   :  { %v137_v61 = vpop.xlane.xlu1 %136 }
 0x212   :  { %v139_v62 = vsub.f32 %v1017_v57, %v137_v61  ;;  %v257_v57 = vunpack.c.l.bf16 %v19_v26 }
 0x214   :  { %v142_v2 = vmul.f32 1.442695, %v139_v62  ;;  %v795_v12 = vpack.i.bf16 %v258_v11, %v257_v57 }
 0x216   :  { %827 = vpow2.f32 %v142_v2  ;;  %796 = vrot.lane.b32.xlu1 %v795_v12, %s885_s9  ;;  %v44_v2 = vld [vmem:[%s1101_s2 + $0x8] sm:$0xff] }
 0x217   :  { %829 = vpow2.f32 %v140_v3  ;;  %v753_v4 = vmul.f32 -1.442695, %v44_v2 }
 0x21c   :  { %v148_v0 = vpop.permute.xlu0 %147  ;;  %v1032_v6 = vpop.eup %827 }
 0x21d   :  { %160 = vmatpush.bf16.msra.mxu1 %v148_v0  ;;  %v830_v8 = vpop.eup %829  ;;  %v43_v0 = vld [vmem:[%s1101_s2] sm:$0xff] }
 0x21e   :  { %v144_v10 = vpack.c.bf16 %v1032_v6, %v830_v8  ;;  %540 = vrot.lane.b32.xlu1 %v769_v28, %s885_s9  ;;  %v752_v3 = vmul.f32 -1.442695, %v43_v0 }
 0x224   :  { %v792_v33 = vpop.permute.xlu2 %791 }
 0x225   :  { %v794_v35 = vunpack.i.h.bf16 %v792_v33  ;;  %v793_v38 = vunpack.i.l.bf16 %v792_v33 }
 0x226   :  { %536 = vrot.lane.b32.xlu1 %v982_v48, %s885_s9 }
 0x229   :  { %v146_v7 = vpop.permute.xlu1 %145 }
 0x22a   :  { %161 = vmatpush.bf16.msra.mxu1 %v146_v7 }
 0x22d   :  { %740 = vmatmul.msk.bf16.vlgmr.msra.gmra.mxu1 %vm45_vm1, %v144_v10  ;;  %v543_v10 = vpop.permute.xlu2 %542 }
 0x22e   :  { %446 = vmatpush.bf16.msrb.mxu1 %v437_v9  ;;  %560 = vmatpush.bf16.msrb.mxu3 %v543_v10 }
 0x235   :  { %v539_v16 = vpop.permute.xlu2 %538 }
 0x286   :  { %v786_v13 = vpop.trf.xlu0 }
 0x287   :  { %746 = vmatmul.msk.bf16.vlgmr.msra.gmra.mxu3 %vm302_vm8, %v786_v13 }
 0x288   :  { %v797_v39 = vpop.permute.xlu1 %796 }
 0x289   :  { %v799_v40 = vunpack.i.h.bf16 %v797_v39  ;;  %v798_v43 = vunpack.i.l.bf16 %v797_v39 }
 0x28e   :  { %v787_v14 = vpop.trf.xlu0 }
 0x28f   :  { %749 = vmatmul.msk.bf16.vlgmr.msrb.gmra.mxu1 %vm302_vm8, %v787_v14 }
 0x290   :  { %v541_v13 = vpop.permute.xlu1 %540 }
 0x291   :  { %561 = vmatpush.bf16.msrb.mxu3 %v541_v13 }
 0x295   :  { %562 = vmatpush.bf16.msrb.mxu3 %v539_v16 }
 0x296   :  { %v788_v15 = vpop.trf.xlu0 }
 0x297   :  { %747 = vmatmul.msk.bf16.gmra.mxu3 %vm302_vm8, %v788_v15 }
 0x29e   :  { %v789_v20 = vpop.trf.xlu0 }
 0x29f   :  { %750 = vmatmul.msk.bf16.gmra.mxu1 %vm302_vm8, %v789_v20 }
 0x2aa   :  { %v163_v22 = vpop.f32.mrf.mxu1 }
 0x2ab   :  { %831 = vrcp.f32 %v163_v22 }
 0x2b1   :  { %v832_v36 = vpop.eup %831 }
 0x2b2   :  { %v165_v23 = vpop.f32.mrf.mxu1  ;;  %v170_v54 = vmul.f32 %v832_v36, %v830_v8 }
 0x2b3   :  { %833 = vrcp.f32 %v165_v23 }
 0x2b4   :  { %v354_v62 = vpack.c.bf16 %v170_v54, %v170_v54  ;;  %835 = vpow2.f32 %v752_v3 }
 0x2b5   :  { %837 = vpow2.f32 %v753_v4 }
 0x2b9   :  { %v834_v51 = vpop.eup %833 }
 0x2ba   :  { %v171_v60 = vmul.f32 %v834_v51, %v1032_v6  ;;  %v836_v6 = vpop.eup %835 }
 0x2bb   :  { %v838_v7 = vpop.eup %837  ;;  %v487_v8 = vadd.f32 1.0, %v836_v6 }
 0x2bc   :  { %v464_v63 = vpack.c.bf16 %v171_v60, %v171_v60  ;;  %v488_v9 = vadd.f32 1.0, %v838_v7 }
 0x2bd   :  { %839 = vrcp.f32 %v487_v8  ;;  %v500_v18 = vand.u32 2147483648, %v487_v8  ;;  %vm494_vm9 = vweird.f32 %v487_v8  ;;  %v498_v23 = vand.u32 2147483647, %v487_v8 }
 0x2be   :  { %841 = vrcp.f32 %v488_v9  ;;  %v515_v20 = vand.u32 2147483648, %v488_v9  ;;  %vm509_vm12 = vweird.f32 %v488_v9  ;;  %v513_v29 = vand.u32 2147483647, %v488_v9 }
 0x2bf   :  { %vm499_vm14 = vcmp.eq.f32.partialorder %v498_v23, 8.507059e+37 }
 0x2c0   :  { %vm514_vm2 = vcmp.eq.f32.partialorder %v513_v29, 8.507059e+37 }
 0x2c3   :  { %v840_v26 = vpop.eup %839 }
 0x2c4   :  { %v842_v57 = vpop.eup %841  ;;  %v490_v11 = vmul.f32 %v840_v26, %v487_v8  ;;  %vm495_vm10 = vweird.f32 %v840_v26 }
 0x2c5   :  { %v505_v12 = vmul.f32 %v842_v57, %v488_v9  ;;  %vm496_vm11 = vmor %vm494_vm9, %vm495_vm10  ;;  %vm510_vm13 = vweird.f32 %v842_v57 }
 0x2c6   :  { %v491_v14 = vsub.f32 1.0, %v490_v11  ;;  %vm511_vm15 = vmor %vm509_vm12, %vm510_vm13 }
 0x2c7   :  { %v506_v15 = vsub.f32 1.0, %v505_v12 }
 0x2c8   :  { %v492_v17 = vmul.f32 %v840_v26, %v491_v14 }
 0x2c9   :  { %v507_v19 = vmul.f32 %v842_v57, %v506_v15 }
 0x2ca   :  { %v493_v22 = vadd.f32 %v840_v26, %v492_v17 }
 0x2cc   :  { %v497_v28 = vsel %vm496_vm11, %v840_v26, %v493_v22 }
 0x30a   :  { %v322_v24 = vpop.f32.mrf.mxu3 }
 0x30b   :  { %v348_v42 = vmul.f32 %v798_v43, %v322_v24  ;;  %v501_v24 = vor.u32 1.1754944e-38, %v500_v18 }
 0x30c   :  { %v448_v25 = vpop.f32.mrf.mxu1 }
 0x30d   :  { %v458_v58 = vmul.f32 %v798_v43, %v448_v25  ;;  %v508_v25 = vadd.f32 %v842_v57, %v507_v19 }
 0x30f   :  { %v512_v33 = vsel %vm511_vm15, %v842_v57, %v508_v25 }
 0x312   :  { %v324_v30 = vpop.f32.mrf.mxu3 }
 0x313   :  { %v349_v27 = vmul.f32 %v799_v40, %v324_v30  ;;  %v516_v30 = vor.u32 1.1754944e-38, %v515_v20 }
 0x314   :  { %v450_v31 = vpop.f32.mrf.mxu1 }
 0x315   :  { %v459_v52 = vmul.f32 %v799_v40, %v450_v31  ;;  %v352_v59 = vpack.c.bf16 %v349_v27, %v348_v42  ;;  %v37_v31 = vld [vmem:[%s1102_s3 + $0x30] sm:$0x1]  ;;  %v517_v39 = vsel %vm514_vm2, %v516_v30, %v512_v33 }
 0x317   :  { %v462_v61 = vpack.c.bf16 %v459_v52, %v458_v58 }
 0x31a   :  { %v327_v32 = vpop.f32.mrf.mxu3 }
 0x31b   :  { %v350_v44 = vmul.f32 %v793_v38, %v327_v32  ;;  %v502_v32 = vsel %vm499_vm14, %v501_v24, %v497_v28 }
 0x31c   :  { %v453_v34 = vpop.f32.mrf.mxu1 }
 0x31d   :  { %v460_v37 = vmul.f32 %v793_v38, %v453_v34  ;;  %v38_v34 = vunpack.c.l.bf16 %v37_v31  ;;  %v519_v38 = vmul.f32 %v502_v32, %v43_v0 }
 0x31f   :  { %v522_v40 = vperm.slane %v38_v34, 0 }
 0x321   :  { %549 = vrot.lane.b32.xlu0 %v522_v40, %s885_s9 }
 0x322   :  { %v329_v41 = vpop.f32.mrf.mxu3 }
 0x323   :  { %v351_v46 = vmul.f32 %v794_v35, %v329_v41  ;;  %v520_v41 = vmul.f32 %v517_v39, %v44_v2 }
 0x324   :  { %v455_v49 = vpop.f32.mrf.mxu1 }
 0x325   :  { %v461_v48 = vmul.f32 %v794_v35, %v455_v49  ;;  %v353_v50 = vpack.c.bf16 %v351_v46, %v350_v44  ;;  %v537_v35 = vpop.permute.xlu1 %536  ;;  %v521_v43 = vpack.c.bf16 %v520_v41, %v519_v38 }
 0x326   :  { %563 = vmatpush.bf16.msrb.mxu3 %v537_v35 }
 0x327   :  { %364 = vmatpush.bf16.msrb.mxu0 %v353_v50  ;;  %v463_v53 = vpack.c.bf16 %v461_v48, %v460_v37  ;;  %v25_v37 = vld [vmem:[%s1102_s3] sm:$0x2]  ;;  %s886_s3 = smov [#allocation2]  }
 0x328   :  { %v26_v48 = vunpack.c.l.bf16 %v25_v37  ;;  %s717_s23 = sshll.u32 %s886_s3, 4  ;;  %s718_s23 = int_to_ptr.vmem [resolvable:$true] %s717_s23 }
 0x329   :  { %474 = vmatpush.bf16.msrb.mxu2 %v463_v53  ;;  %762 = vmatmul.msk.bf16.vlgmr.msrb.gmra.mxu3 %vm552_vm3, %v521_v43 }
 0x32a   :  { %v614_v51 = vperm.slane %v26_v48, 2  ;;  %v621_v42 = vperm.slane %v26_v48, 3 }
 0x32b   :  { %365 = vmatpush.bf16.msrb.mxu0 %v352_v59 }
 0x32c   :  { %v800_v52 = vpack.i.bf16 %v621_v42, %v614_v51 }
 0x32d   :  { %475 = vmatpush.bf16.msrb.mxu2 %v462_v61 }
 0x32e   :  { %748 = vmatmul.msk.bf16.vlgmr.msrb.gmra.mxu0 %vm45_vm1, %v354_v62 }
 0x330   :  { %751 = vmatmul.msk.bf16.vlgmr.msrb.gmra.mxu2 %vm45_vm1, %v464_v63 }
 0x393   :  { %v550_v6 = vpop.permute.xlu0 %549 }
 0x3ab   :  { %v367_v44 = vpop.f32.mrf.mxu0 }
 0x3ac   :  { %v570_v46 = vsel %vm45_vm1, %v367_v44, 0.0  ;;  %v565_v3 = vpop.f32.mrf.mxu3 }
 0x3ad   :  { %571 = vadd.xlane.f32.xlu2 %v570_v46  ;;  %v566_v8 = vadd.f32 %v565_v3, %v550_v6 }
 0x3b3   :  { %v369_v49 = vpop.f32.mrf.mxu0  ;;  %v477_v36 = vpop.f32.mrf.mxu2 }
 0x3b4   :  { %v573_v27 = vsel %vm45_vm1, %v477_v36, 0.0  ;;  %v567_v4 = vpop.f32.mrf.mxu3 }
 0x3b5   :  { %574 = vadd.xlane.f32.xlu1 %v573_v27  ;;  %v568_v7 = vadd.f32 %v567_v4, %v550_v6  ;;  %v681_v27 = vperm.slane %v24_v56, 1 }
 0x3bb   :  { %v479_v50 = vpop.f32.mrf.mxu2 }
 0x3c5   :  { %801 = vrot.lane.b32.xlu2 %v800_v52, %s883_s5 }
 0x420   :  { %v572_v53 = vpop.xlane.xlu2 %571 }
 0x421   :  { %v576_v54 = vmul.f32 %v572_v53, %v936_v21 }
 0x423   :  { %v578_v58 = vsub.f32 %v367_v44, %v576_v54 }
 0x425   :  { %v580_v59 = vmul.f32 %v578_v58, %v578_v58 }
 0x427   :  { %v582_v60 = vsel %vm45_vm1, %v580_v59, 0.0 }
 0x428   :  { %583 = vadd.xlane.f32.xlu2 %v582_v60  ;;  %v575_v61 = vpop.xlane.xlu1 %574  ;;  %v802_v9 = vpop.permute.xlu2 %801 }
 0x429   :  { %v577_v62 = vmul.f32 %v575_v61, %v936_v21  ;;  %v803_v23 = vunpack.i.l.bf16 %v802_v9  ;;  %v804_v28 = vunpack.i.h.bf16 %v802_v9 }
 0x42b   :  { %v579_v63 = vsub.f32 %v477_v36, %v577_v62 }
 0x42d   :  { %v581_v0 = vmul.f32 %v579_v63, %v579_v63 }
 0x42f   :  { %v585_v2 = vsel %vm45_vm1, %v581_v0, 0.0 }
 0x430   :  { %586 = vadd.xlane.f32.xlu1 %v585_v2 }
 0x440   :  { %634 = vrot.lane.b32.xlu2 %v568_v7, %s884_s8 }
 0x448   :  { %682 = vrot.lane.b32.xlu2 %v977_v47, %s884_s8 }
 0x449   :  { %632 = vrot.lane.b32.xlu1 %v566_v8, %s884_s8 }
 0x451   :  { %684 = vrot.lane.b32.xlu1 %v971_v45, %s884_s8 }
 0x459   :  { %689 = vrot.lane.b32.xlu1 %v681_v27, %s883_s5 }
 0x49b   :  { %v584_v10 = vpop.xlane.xlu2 %583 }
 0x49c   :  { %v588_v26 = vmul.f32 %v584_v10, %v936_v21 }
 0x49e   :  { %v590_v57 = vadd.f32 1e-05, %v588_v26 }
 0x4a0   :  { %843 = vrsqrt.f32 %v590_v57  ;;  %vm598_vm0 = vweird.f32 %v590_v57 }
 0x4a3   :  { %v587_v11 = vpop.xlane.xlu1 %586  ;;  %v635_v40 = vpop.permute.xlu2 %634 }
 0x4a4   :  { %v589_v12 = vmul.f32 %v587_v11, %v936_v21 }
 0x4a6   :  { %v844_v13 = vpop.eup %843  ;;  %v591_v14 = vadd.f32 1e-05, %v589_v12 }
 0x4a7   :  { %v593_v15 = vmul.f32 %v844_v13, %v590_v57  ;;  %vm599_vm4 = vweird.f32 %v844_v13 }
 0x4a8   :  { %845 = vrsqrt.f32 %v591_v14  ;;  %vm600_vm5 = vmor %vm598_vm0, %vm599_vm4  ;;  %vm608_vm7 = vweird.f32 %v591_v14 }
 0x4a9   :  { %v594_v16 = vmul.f32 %v844_v13, %v593_v15 }
 0x4ab   :  { %v595_v47 = vmul.f32 0.5, %v594_v16  ;;  %v683_v37 = vpop.permute.xlu2 %682 }
 0x4ad   :  { %v596_v17 = vsub.f32 1.5, %v595_v47 }
 0x4ae   :  { %v846_v18 = vpop.eup %845 }
 0x4af   :  { %v597_v19 = vmul.f32 %v844_v13, %v596_v17  ;;  %v603_v45 = vmul.f32 %v846_v18, %v591_v14  ;;  %vm609_vm6 = vweird.f32 %v846_v18 }
 0x4b0   :  { %vm610_vm8 = vmor %vm608_vm7, %vm609_vm6 }
 0x4b1   :  { %v601_v20 = vsel %vm600_vm5, %v844_v13, %v597_v19  ;;  %v604_v22 = vmul.f32 %v846_v18, %v603_v45 }
 0x4b2   :  { %v612_v24 = vmul.f32 %v601_v20, %v578_v58 }
 0x4b3   :  { %v605_v25 = vmul.f32 0.5, %v604_v22 }
 0x4b4   :  { %v619_v21 = vmul.f32 %v803_v23, %v612_v24 }
 0x4b5   :  { %v606_v29 = vsub.f32 1.5, %v605_v25 }
 0x4b6   :  { %v626_v30 = vadd.f32 %v804_v28, %v619_v21 }
 0x4b7   :  { %v607_v31 = vmul.f32 %v846_v18, %v606_v29 }
 0x4b8   :  { %v628_v34 = vmul.f32 %v626_v30, %v566_v8 }
 0x4b9   :  { %v611_v32 = vsel %vm610_vm8, %v846_v18, %v607_v31 }
 0x4ba   :  { %v613_v33 = vmul.f32 %v611_v32, %v579_v63 }
 0x4bb   :  { %v633_v35 = vpop.permute.xlu1 %632 }
 0x4bc   :  { %v620_v38 = vmul.f32 %v803_v23, %v613_v33  ;;  %v638_v39 = vadd.f32 %v633_v35, %v628_v34 }
 0x4be   :  { %v627_v41 = vadd.f32 %v804_v28, %v620_v38  ;;  %v763_v43 = vmul.f32 -1.442695, %v638_v39 }
 0x4c0   :  { %v629_v44 = vmul.f32 %v627_v41, %v568_v7  ;;  %847 = vpow2.f32 %v763_v43 }
 0x4c2   :  { %v639_v46 = vadd.f32 %v635_v40, %v629_v44 }
 0x4c3   :  { %v685_v49 = vpop.permute.xlu1 %684 }
 0x4c4   :  { %v764_v36 = vmul.f32 -1.442695, %v639_v46  ;;  %701 = vmatpush.bf16.msra.mxu0 %v685_v49 }
 0x4c6   :  { %v848_v48 = vpop.eup %847  ;;  %849 = vpow2.f32 %v764_v36 }
 0x4c7   :  { %v646_v50 = vadd.f32 1.0, %v848_v48 }
 0x4c8   :  { %702 = vmatpush.bf16.msra.mxu0 %v683_v37 }
 0x4c9   :  { %851 = vrcp.f32 %v646_v50  ;;  %v659_v55 = vand.u32 2147483648, %v646_v50  ;;  %vm653_vm10 = vweird.f32 %v646_v50  ;;  %v657_v62 = vand.u32 2147483647, %v646_v50 }
 0x4cb   :  { %v660_v4 = vor.u32 1.1754944e-38, %v659_v55  ;;  %vm658_vm14 = vcmp.eq.f32.partialorder %v657_v62, 8.507059e+37  ;;  %v690_v12 = vpop.permute.xlu1 %689 }
 0x4cc   :  { %v850_v51 = vpop.eup %849 }
 0x4cd   :  { %v647_v42 = vadd.f32 1.0, %v850_v51 }
 0x4cf   :  { %v852_v52 = vpop.eup %851  ;;  %853 = vrcp.f32 %v647_v42  ;;  %v674_v63 = vand.u32 2147483648, %v647_v42  ;;  %v672_v2 = vand.u32 2147483647, %v647_v42  ;;  %vm668_vm13 = vweird.f32 %v647_v42 }
 0x4d0   :  { %v649_v53 = vmul.f32 %v852_v52, %v646_v50  ;;  %vm654_vm9 = vweird.f32 %v852_v52 }
 0x4d1   :  { %vm655_vm11 = vmor %vm653_vm10, %vm654_vm9  ;;  %v675_v7 = vor.u32 1.1754944e-38, %v674_v63  ;;  %vm673_vm2 = vcmp.eq.f32.partialorder %v672_v2, 8.507059e+37 }
 0x4d2   :  { %v650_v54 = vsub.f32 1.0, %v649_v53 }
 0x4d4   :  { %v651_v58 = vmul.f32 %v852_v52, %v650_v54 }
 0x4d5   :  { %v854_v59 = vpop.eup %853 }
 0x4d6   :  { %v664_v60 = vmul.f32 %v854_v59, %v647_v42  ;;  %v652_v61 = vadd.f32 %v852_v52, %v651_v58  ;;  %vm669_vm12 = vweird.f32 %v854_v59 }
 0x4d7   :  { %vm670_vm15 = vmor %vm668_vm13, %vm669_vm12 }
 0x4d8   :  { %v665_v56 = vsub.f32 1.0, %v664_v60  ;;  %v656_v3 = vsel %vm655_vm11, %v852_v52, %v652_v61 }
 0x4d9   :  { %v661_v8 = vsel %vm658_vm14, %v660_v4, %v656_v3 }
 0x4da   :  { %v666_v0 = vmul.f32 %v854_v59, %v665_v56  ;;  %v678_v57 = vmul.f32 %v661_v8, %v638_v39 }
 0x4dc   :  { %v667_v6 = vadd.f32 %v854_v59, %v666_v0 }
 0x4de   :  { %v671_v9 = vsel %vm670_vm15, %v854_v59, %v667_v6 }
 0x4df   :  { %v676_v10 = vsel %vm673_vm2, %v675_v7, %v671_v9 }
 0x4e0   :  { %v679_v26 = vmul.f32 %v676_v10, %v639_v46 }
 0x4e2   :  { %v680_v11 = vpack.c.bf16 %v679_v26, %v678_v57 }
 0x4e4   :  { %765 = vmatmul.msk.bf16.vlgmr.msra.gmra.mxu0 %vm45_vm1, %v680_v11 }
 0x561   :  { %v704_v13 = vpop.f32.mrf.mxu0 }
 0x562   :  { %v705_v14 = vadd.f32 %v704_v13, %v690_v12 }
 0x564   :  { %v709_v15 = vadd.f32 %v705_v14, %v920_v1 }
 0x566   :  { %711 = vst.msk [vmem:[#allocation2] sm:$0xff] %vm45_vm1, %v709_v15 }
 0x569   :  { %v706_v16 = vpop.f32.mrf.mxu0 }
 0x56a   :  { %v707_v47 = vadd.f32 %v706_v16, %v690_v12 }
 0x56c   :  { %v710_v17 = vadd.f32 %v707_v47, %v931_v5 }
 0x56e   :  { %712 = vst.msk [vmem:[#allocation2 + $0x8] sm:$0xff] %vm45_vm1, %v710_v17 }
 0x56f   :  { %725 = dma.vmem_to_hbm [thread:$0]  %s718_s23, 256, %s720_s26, [#allocation3], %s887_s27, %s887_s27, %s888_s28  }
 0x570   :  { %879 = dma.done.wait [#allocation3], 256  }
 0x571   :  { %880 = vsyncadd [#allocation3], 4294967040 }
 0x572   :  { %730 = vsyncpa [#allocation3], 1 }

</bundles_post_ra>
